<compile_context>
chip_gen: v7x
topology: tpu7x:2x2x1
jax: 0.10.0
libtpu: 0.0.40
codegen_flags: <defaults>
</compile_context>

<pallas_src>
import functools

import jax
import jax.numpy as jnp
import numpy as np
from jax.experimental import pallas as pl
from jax.experimental.pallas import tpu as pltpu

PAD = 128  # lane-aligned zero halo on each side of the flattened spatial axis


def _eresblock_kernel(x_ref, w1_ref, b1_ref, w2_ref, b2_ref, wp_ref, bp_ref,
                      o_ref, buf, *, W):
    # x_ref / o_ref: (1, C, H*W)     buf: (C, PAD + H*W + PAD) f32 scratch
    _, C, HW = x_ref.shape

    # Zero the halos every step (lane-aligned, ~2 tiny stores).  Deliberately
    # NOT under pl.when(program_id == 0): the batch grid axis is "parallel",
    # so each TensorCore has its own scratch and might never run step 0.
    buf[:, :PAD] = jnp.zeros((C, PAD), jnp.float32)
    buf[:, PAD + HW:] = jnp.zeros((C, PAD), jnp.float32)

    # Lane masks zeroing the taps that would wrap across a row edge.
    col = jax.lax.broadcasted_iota(jnp.int32, (1, HW), 1) % W
    mask_l = (col != 0).astype(jnp.float32)      # kx = -1 invalid at w == 0
    mask_r = (col != W - 1).astype(jnp.float32)  # kx = +1 invalid at w == W-1

    def im2col():
        # 9 shifted lane-dense views of the zero-haloed activation -> (9*C, HW)
        taps = []
        for ky in (-1, 0, 1):
            for kx in (-1, 0, 1):
                d = ky * W + kx
                s = buf[:, PAD + d:PAD + d + HW]
                if kx == -1:
                    s = s * mask_l
                elif kx == 1:
                    s = s * mask_r
                taps.append(s)
        return jnp.concatenate(taps, axis=0)

    x = x_ref[0]                                  # (C, HW) residual, lane-dense

    # conv1 + relu : single (C, 9C) @ (9C, HW) MXU matmul
    buf[:, PAD:PAD + HW] = x
    h1 = jnp.maximum(
        jnp.dot(w1_ref[...], im2col(), preferred_element_type=jnp.float32)
        + b1_ref[...], 0.0)

    # conv2 + relu : reuse the same padded scratch (halo still zero)
    buf[:, PAD:PAD + HW] = h1
    h2 = jnp.maximum(
        jnp.dot(w2_ref[...], im2col(), preferred_element_type=jnp.float32)
        + b2_ref[...], 0.0)

    # 1x1 pointwise + residual + relu
    out = (jnp.dot(wp_ref[...], h2, preferred_element_type=jnp.float32)
           + bp_ref[...] + x)
    o_ref[0] = jnp.maximum(out, 0.0).astype(o_ref.dtype)


def eresidual_block(x_nchw, w1, b1, w2, b2, wp, bp):
    """x_nchw: (N, C, H, W); w1/w2 OIHW (C, C, 3, 3) (PyTorch layout);
    wp (C, C, 1, 1); biases (C,)."""
    N, C, H, W = x_nchw.shape
    HW = H * W
    assert w1.shape == (C, C, 3, 3) and w2.shape == (C, C, 3, 3), \
        "kernel assumes in_channels == out_channels and groups == 1"
    assert wp.reshape(-1).shape[0] == C * C
    assert HW % 128 == 0, "H*W must be a multiple of 128 for lane-dense tiles"
    assert W + 1 <= PAD

    x2d = x_nchw.reshape(N, C, HW)                          # contiguous, free
    # OIHW -> (Cout, (ky*3+kx)*Cin + ci), matching the in-kernel im2col order.
    w1m = jnp.transpose(w1, (0, 2, 3, 1)).reshape(C, 9 * C)
    w2m = jnp.transpose(w2, (0, 2, 3, 1)).reshape(C, 9 * C)
    wpm = wp.reshape(C, C)
    b1c, b2c, bpc = (b.reshape(C, 1) for b in (b1, b2, bp))

    kernel = functools.partial(_eresblock_kernel, W=W)
    out2d = pl.pallas_call(
        kernel,
        out_shape=jax.ShapeDtypeStruct((N, C, HW), x_nchw.dtype),
        grid_spec=pltpu.PrefetchScalarGridSpec(
            num_scalar_prefetch=0,
            grid=(N,),
            in_specs=[
                pl.BlockSpec((1, C, HW), lambda n: (n, 0, 0)),
                pl.BlockSpec((C, 9 * C), lambda n: (0, 0)),
                pl.BlockSpec((C, 1), lambda n: (0, 0)),
                pl.BlockSpec((C, 9 * C), lambda n: (0, 0)),
                pl.BlockSpec((C, 1), lambda n: (0, 0)),
                pl.BlockSpec((C, C), lambda n: (0, 0)),
                pl.BlockSpec((C, 1), lambda n: (0, 0)),
            ],
            out_specs=pl.BlockSpec((1, C, HW), lambda n: (n, 0, 0)),
            scratch_shapes=[pltpu.VMEM((C, PAD + HW + PAD), jnp.float32)],
        ),
        compiler_params=pltpu.CompilerParams(
            dimension_semantics=("parallel",)),
    )(x2d, w1m, b1c, w2m, b2c, wpm, bpc)

    # Note: for production-size images, tile H*W into multiple-of-128 lane
    # strips (with a 1-row halo) so the per-step VMEM stays within v7x's
    # 64 MiB, and set vmem_limit_bytes explicitly.
    return out2d.reshape(N, C, H, W)


def _reference(x, w1, b1, w2, b2, wp, bp):
    """Pure-JAX reference mirroring F.conv2d (NCHW / OIHW) semantics."""
    dn = ('NCHW', 'OIHW', 'NCHW')

    def conv(a, w, b, pad):
        y = jax.lax.conv_general_dilated(
            a, w, (1, 1), [(pad, pad), (pad, pad)], dimension_numbers=dn)
        return y + b.reshape(1, -1, 1, 1)

    h = jax.nn.relu(conv(x, w1, b1, 1))
    h = jax.nn.relu(conv(h, w2, b2, 1))
    return jax.nn.relu(conv(h, wp, bp, 0) + x)


if __name__ == "__main__":
    N, C, H, W = 2, 4, 16, 16           # in_channels == out_channels (residual)
    key = jax.random.PRNGKey(0)
    kx, k1, kb1, k2, kb2, kp, kbp = jax.random.split(key, 7)

    x = jax.random.normal(kx, (N, C, H, W), jnp.float32)
    w1 = jax.random.normal(k1, (C, C, 3, 3), jnp.float32) * 0.1   # OIHW
    b1 = jax.random.normal(kb1, (C,), jnp.float32) * 0.1
    w2 = jax.random.normal(k2, (C, C, 3, 3), jnp.float32) * 0.1
    b2 = jax.random.normal(kb2, (C,), jnp.float32) * 0.1
    wp = jax.random.normal(kp, (C, C, 1, 1), jnp.float32) * 0.1
    bp = jax.random.normal(kbp, (C,), jnp.float32) * 0.1

    out = jax.block_until_ready(eresidual_block(x, w1, b1, w2, b2, wp, bp))

    ref = _reference(x, w1, b1, w2, b2, wp, bp)
    np.testing.assert_allclose(np.asarray(out), np.asarray(ref),
                               rtol=1e-5, atol=1e-5)
    print("KERNEL_OK")
</pallas_src>

<mosaic_0001>
module attributes {stable_mosaic.version = 11 : i64} {
  func.func @_eresblock_kernel(%arg0: i32, %arg1: memref<1x4x256xf32, #tpu.memory_space<vmem>>, %arg2: memref<4x36xf32, #tpu.memory_space<vmem>>, %arg3: memref<4x1xf32, #tpu.memory_space<vmem>>, %arg4: memref<4x36xf32, #tpu.memory_space<vmem>>, %arg5: memref<4x1xf32, #tpu.memory_space<vmem>>, %arg6: memref<4x4xf32, #tpu.memory_space<vmem>>, %arg7: memref<4x1xf32, #tpu.memory_space<vmem>>, %arg8: memref<1x4x256xf32, #tpu.memory_space<vmem>>, %arg9: memref<4x512xf32, #tpu.memory_space<vmem>>) attributes {dimension_semantics = [#tpu.dimension_semantics<parallel>], iteration_bounds = array<i64: 2>, scalar_prefetch = 0 : i64, scratch_operands = 1 : i64, tpu.core_type = #tpu.core_type<tc>, window_params = [{transform_indices = @transform_0, window_bounds = array<i64: 1, 4, 256>}, {pipeline_mode = #tpu.pipeline_mode<synchronous>, transform_indices = @transform_1, window_bounds = array<i64: 4, 36>}, {pipeline_mode = #tpu.pipeline_mode<synchronous>, transform_indices = @transform_2, window_bounds = array<i64: 4, 1>}, {pipeline_mode = #tpu.pipeline_mode<synchronous>, transform_indices = @transform_3, window_bounds = array<i64: 4, 36>}, {pipeline_mode = #tpu.pipeline_mode<synchronous>, transform_indices = @transform_4, window_bounds = array<i64: 4, 1>}, {pipeline_mode = #tpu.pipeline_mode<synchronous>, transform_indices = @transform_5, window_bounds = array<i64: 4, 4>}, {pipeline_mode = #tpu.pipeline_mode<synchronous>, transform_indices = @transform_6, window_bounds = array<i64: 4, 1>}, {transform_indices = @transform_7, window_bounds = array<i64: 1, 4, 256>}]} {
    %cst = arith.constant 0.000000e+00 : f32
    %0 = vector.broadcast %cst : f32 to vector<4x128xf32>
    %c0 = arith.constant 0 : index
    %c0_0 = arith.constant 0 : index
    %1 = vector.load %arg9[%c0, %c0_0] : memref<4x512xf32, #tpu.memory_space<vmem>>, vector<4x128xf32>
    tpu.vector_store %arg9[%c0, %c0_0], %0 {strides = array<i32>} : memref<4x512xf32, #tpu.memory_space<vmem>>, vector<4x128xf32>,
    %cst_1 = arith.constant 0.000000e+00 : f32
    %2 = vector.broadcast %cst_1 : f32 to vector<4x128xf32>
    %c0_2 = arith.constant 0 : index
    %c384 = arith.constant 384 : index
    %3 = vector.load %arg9[%c0_2, %c384] : memref<4x512xf32, #tpu.memory_space<vmem>>, vector<4x128xf32>
    tpu.vector_store %arg9[%c0_2, %c384], %2 {strides = array<i32>} : memref<4x512xf32, #tpu.memory_space<vmem>>, vector<4x128xf32>,
    %4 = tpu.iota {dimensions = array<i32: 1>} : vector<1x256xi32>
    %c16_i32 = arith.constant 16 : i32
    %c0_i32 = arith.constant 0 : i32
    %5 = arith.cmpi eq, %c16_i32, %c0_i32 : i32
    %c1_i32 = arith.constant 1 : i32
    %6 = arith.select %5, %c1_i32, %c16_i32 : i32
    %7 = vector.broadcast %6 : i32 to vector<1x256xi32>
    %8 = arith.remsi %4, %7 : vector<1x256xi32>
    %c0_i32_3 = arith.constant 0 : i32
    %9 = vector.broadcast %c0_i32_3 : i32 to vector<1x256xi32>
    %10 = arith.cmpi ne, %8, %9 : vector<1x256xi32>
    %c0_i32_4 = arith.constant 0 : i32
    %11 = vector.broadcast %c0_i32_4 : i32 to vector<1x256xi32>
    %12 = arith.cmpi slt, %8, %11 : vector<1x256xi32>
    %c0_i32_5 = arith.constant 0 : i32
    %13 = arith.cmpi slt, %6, %c0_i32_5 : i32
    %14 = vector.broadcast %13 : i1 to vector<1x256xi1>
    %15 = vector.broadcast %14 : vector<1x256xi1> to vector<1x256xi1>
    %16 = arith.xori %12, %15 : vector<1x256xi1>
    %17 = arith.andi %16, %10 : vector<1x256xi1>
    %18 = vector.broadcast %6 : i32 to vector<1x256xi32>
    %19 = arith.addi %8, %18 : vector<1x256xi32>
    %20 = arith.select %17, %19, %8 : vector<1x256xi1>, vector<1x256xi32>
    %c0_i32_6 = arith.constant 0 : i32
    %21 = vector.broadcast %c0_i32_6 : i32 to vector<1x256xi32>
    %22 = arith.cmpi ne, %20, %21 : vector<1x256xi32>
    %23 = arith.extui %22 : vector<1x256xi1> to vector<1x256xi32>
    %24 = arith.sitofp %23 : vector<1x256xi32> to vector<1x256xf32>
    %c15_i32 = arith.constant 15 : i32
    %25 = vector.broadcast %c15_i32 : i32 to vector<1x256xi32>
    %26 = arith.cmpi ne, %20, %25 : vector<1x256xi32>
    %27 = arith.extui %26 : vector<1x256xi1> to vector<1x256xi32>
    %28 = arith.sitofp %27 : vector<1x256xi32> to vector<1x256xf32>
    %c0_7 = arith.constant 0 : index
    %c0_8 = arith.constant 0 : index
    %c0_9 = arith.constant 0 : index
    %29 = vector.load %arg1[%c0_7, %c0_8, %c0_9] : memref<1x4x256xf32, #tpu.memory_space<vmem>>, vector<1x4x256xf32>
    %30 = vector.shape_cast %29 : vector<1x4x256xf32> to vector<4x256xf32>
    %c0_10 = arith.constant 0 : index
    %c128 = arith.constant 128 : index
    %31 = vector.load %arg9[%c0_10, %c128] : memref<4x512xf32, #tpu.memory_space<vmem>>, vector<4x256xf32>
    tpu.vector_store %arg9[%c0_10, %c128], %30 {strides = array<i32>} : memref<4x512xf32, #tpu.memory_space<vmem>>, vector<4x256xf32>,
    %c0_11 = arith.constant 0 : index
    %c0_12 = arith.constant 0 : index
    %32 = vector.load %arg2[%c0_11, %c0_12] : memref<4x36xf32, #tpu.memory_space<vmem>>, vector<4x36xf32>
    %c0_13 = arith.constant 0 : index
    %c111 = arith.constant 111 : index
    %33 = vector.load %arg9[%c0_13, %c111] : memref<4x512xf32, #tpu.memory_space<vmem>>, vector<4x256xf32>
    %34 = vector.broadcast %24 : vector<1x256xf32> to vector<4x256xf32>
    %35 = arith.mulf %33, %34 : vector<4x256xf32>
    %c0_14 = arith.constant 0 : index
    %c112 = arith.constant 112 : index
    %36 = vector.load %arg9[%c0_14, %c112] : memref<4x512xf32, #tpu.memory_space<vmem>>, vector<4x256xf32>
    %c0_15 = arith.constant 0 : index
    %c113 = arith.constant 113 : index
    %37 = vector.load %arg9[%c0_15, %c113] : memref<4x512xf32, #tpu.memory_space<vmem>>, vector<4x256xf32>
    %38 = vector.broadcast %28 : vector<1x256xf32> to vector<4x256xf32>
    %39 = arith.mulf %37, %38 : vector<4x256xf32>
    %c0_16 = arith.constant 0 : index
    %c127 = arith.constant 127 : index
    %40 = vector.load %arg9[%c0_16, %c127] : memref<4x512xf32, #tpu.memory_space<vmem>>, vector<4x256xf32>
    %41 = vector.broadcast %24 : vector<1x256xf32> to vector<4x256xf32>
    %42 = arith.mulf %40, %41 : vector<4x256xf32>
    %c0_17 = arith.constant 0 : index
    %c128_18 = arith.constant 128 : index
    %43 = vector.load %arg9[%c0_17, %c128_18] : memref<4x512xf32, #tpu.memory_space<vmem>>, vector<4x256xf32>
    %c0_19 = arith.constant 0 : index
    %c129 = arith.constant 129 : index
    %44 = vector.load %arg9[%c0_19, %c129] : memref<4x512xf32, #tpu.memory_space<vmem>>, vector<4x256xf32>
    %45 = vector.broadcast %28 : vector<1x256xf32> to vector<4x256xf32>
    %46 = arith.mulf %44, %45 : vector<4x256xf32>
    %c0_20 = arith.constant 0 : index
    %c143 = arith.constant 143 : index
    %47 = vector.load %arg9[%c0_20, %c143] : memref<4x512xf32, #tpu.memory_space<vmem>>, vector<4x256xf32>
    %48 = vector.broadcast %24 : vector<1x256xf32> to vector<4x256xf32>
    %49 = arith.mulf %47, %48 : vector<4x256xf32>
    %c0_21 = arith.constant 0 : index
    %c144 = arith.constant 144 : index
    %50 = vector.load %arg9[%c0_21, %c144] : memref<4x512xf32, #tpu.memory_space<vmem>>, vector<4x256xf32>
    %c0_22 = arith.constant 0 : index
    %c145 = arith.constant 145 : index
    %51 = vector.load %arg9[%c0_22, %c145] : memref<4x512xf32, #tpu.memory_space<vmem>>, vector<4x256xf32>
    %52 = vector.broadcast %28 : vector<1x256xf32> to vector<4x256xf32>
    %53 = arith.mulf %51, %52 : vector<4x256xf32>
    %54 = tpu.concatenate %35, %36, %39, %42, %43, %46, %49, %50, %53 in 0 : vector<4x256xf32>, vector<4x256xf32>, vector<4x256xf32>, vector<4x256xf32>, vector<4x256xf32>, vector<4x256xf32>, vector<4x256xf32>, vector<4x256xf32>, vector<4x256xf32> -> vector<36x256xf32>
    %cst_23 = arith.constant dense<0.000000e+00> : vector<4x256xf32>
    %55 = tpu.matmul %32, %54, %cst_23 {dimension_numbers = #tpu.dot_dimension_numbers<[1], [0], [0], [1], [0, 0, 1, 1], [], []>} : vector<4x36xf32>, vector<36x256xf32>, vector<4x256xf32> -> vector<4x256xf32>
    %c0_24 = arith.constant 0 : index
    %c0_25 = arith.constant 0 : index
    %56 = vector.load %arg3[%c0_24, %c0_25] : memref<4x1xf32, #tpu.memory_space<vmem>>, vector<4x1xf32>
    %57 = vector.broadcast %56 : vector<4x1xf32> to vector<4x256xf32>
    %58 = arith.addf %55, %57 : vector<4x256xf32>
    %cst_26 = arith.constant 0.000000e+00 : f32
    %59 = vector.broadcast %cst_26 : f32 to vector<4x256xf32>
    %60 = arith.maximumf %58, %59 : vector<4x256xf32>
    %c0_27 = arith.constant 0 : index
    %c128_28 = arith.constant 128 : index
    %61 = vector.load %arg9[%c0_27, %c128_28] : memref<4x512xf32, #tpu.memory_space<vmem>>, vector<4x256xf32>
    tpu.vector_store %arg9[%c0_27, %c128_28], %60 {strides = array<i32>} : memref<4x512xf32, #tpu.memory_space<vmem>>, vector<4x256xf32>,
    %c0_29 = arith.constant 0 : index
    %c0_30 = arith.constant 0 : index
    %62 = vector.load %arg4[%c0_29, %c0_30] : memref<4x36xf32, #tpu.memory_space<vmem>>, vector<4x36xf32>
    %c0_31 = arith.constant 0 : index
    %c111_32 = arith.constant 111 : index
    %63 = vector.load %arg9[%c0_31, %c111_32] : memref<4x512xf32, #tpu.memory_space<vmem>>, vector<4x256xf32>
    %64 = vector.broadcast %24 : vector<1x256xf32> to vector<4x256xf32>
    %65 = arith.mulf %63, %64 : vector<4x256xf32>
    %c0_33 = arith.constant 0 : index
    %c112_34 = arith.constant 112 : index
    %66 = vector.load %arg9[%c0_33, %c112_34] : memref<4x512xf32, #tpu.memory_space<vmem>>, vector<4x256xf32>
    %c0_35 = arith.constant 0 : index
    %c113_36 = arith.constant 113 : index
    %67 = vector.load %arg9[%c0_35, %c113_36] : memref<4x512xf32, #tpu.memory_space<vmem>>, vector<4x256xf32>
    %68 = vector.broadcast %28 : vector<1x256xf32> to vector<4x256xf32>
    %69 = arith.mulf %67, %68 : vector<4x256xf32>
    %c0_37 = arith.constant 0 : index
    %c127_38 = arith.constant 127 : index
    %70 = vector.load %arg9[%c0_37, %c127_38] : memref<4x512xf32, #tpu.memory_space<vmem>>, vector<4x256xf32>
    %71 = vector.broadcast %24 : vector<1x256xf32> to vector<4x256xf32>
    %72 = arith.mulf %70, %71 : vector<4x256xf32>
    %c0_39 = arith.constant 0 : index
    %c128_40 = arith.constant 128 : index
    %73 = vector.load %arg9[%c0_39, %c128_40] : memref<4x512xf32, #tpu.memory_space<vmem>>, vector<4x256xf32>
    %c0_41 = arith.constant 0 : index
    %c129_42 = arith.constant 129 : index
    %74 = vector.load %arg9[%c0_41, %c129_42] : memref<4x512xf32, #tpu.memory_space<vmem>>, vector<4x256xf32>
    %75 = vector.broadcast %28 : vector<1x256xf32> to vector<4x256xf32>
    %76 = arith.mulf %74, %75 : vector<4x256xf32>
    %c0_43 = arith.constant 0 : index
    %c143_44 = arith.constant 143 : index
    %77 = vector.load %arg9[%c0_43, %c143_44] : memref<4x512xf32, #tpu.memory_space<vmem>>, vector<4x256xf32>
    %78 = vector.broadcast %24 : vector<1x256xf32> to vector<4x256xf32>
    %79 = arith.mulf %77, %78 : vector<4x256xf32>
    %c0_45 = arith.constant 0 : index
    %c144_46 = arith.constant 144 : index
    %80 = vector.load %arg9[%c0_45, %c144_46] : memref<4x512xf32, #tpu.memory_space<vmem>>, vector<4x256xf32>
    %c0_47 = arith.constant 0 : index
    %c145_48 = arith.constant 145 : index
    %81 = vector.load %arg9[%c0_47, %c145_48] : memref<4x512xf32, #tpu.memory_space<vmem>>, vector<4x256xf32>
    %82 = vector.broadcast %28 : vector<1x256xf32> to vector<4x256xf32>
    %83 = arith.mulf %81, %82 : vector<4x256xf32>
    %84 = tpu.concatenate %65, %66, %69, %72, %73, %76, %79, %80, %83 in 0 : vector<4x256xf32>, vector<4x256xf32>, vector<4x256xf32>, vector<4x256xf32>, vector<4x256xf32>, vector<4x256xf32>, vector<4x256xf32>, vector<4x256xf32>, vector<4x256xf32> -> vector<36x256xf32>
    %cst_49 = arith.constant dense<0.000000e+00> : vector<4x256xf32>
    %85 = tpu.matmul %62, %84, %cst_49 {dimension_numbers = #tpu.dot_dimension_numbers<[1], [0], [0], [1], [0, 0, 1, 1], [], []>} : vector<4x36xf32>, vector<36x256xf32>, vector<4x256xf32> -> vector<4x256xf32>
    %c0_50 = arith.constant 0 : index
    %c0_51 = arith.constant 0 : index
    %86 = vector.load %arg5[%c0_50, %c0_51] : memref<4x1xf32, #tpu.memory_space<vmem>>, vector<4x1xf32>
    %87 = vector.broadcast %86 : vector<4x1xf32> to vector<4x256xf32>
    %88 = arith.addf %85, %87 : vector<4x256xf32>
    %cst_52 = arith.constant 0.000000e+00 : f32
    %89 = vector.broadcast %cst_52 : f32 to vector<4x256xf32>
    %90 = arith.maximumf %88, %89 : vector<4x256xf32>
    %c0_53 = arith.constant 0 : index
    %c0_54 = arith.constant 0 : index
    %91 = vector.load %arg6[%c0_53, %c0_54] : memref<4x4xf32, #tpu.memory_space<vmem>>, vector<4x4xf32>
    %cst_55 = arith.constant dense<0.000000e+00> : vector<4x256xf32>
    %92 = tpu.matmul %91, %90, %cst_55 {dimension_numbers = #tpu.dot_dimension_numbers<[1], [0], [0], [1], [0, 0, 1, 1], [], []>} : vector<4x4xf32>, vector<4x256xf32>, vector<4x256xf32> -> vector<4x256xf32>
    %c0_56 = arith.constant 0 : index
    %c0_57 = arith.constant 0 : index
    %93 = vector.load %arg7[%c0_56, %c0_57] : memref<4x1xf32, #tpu.memory_space<vmem>>, vector<4x1xf32>
    %94 = vector.broadcast %93 : vector<4x1xf32> to vector<4x256xf32>
    %95 = arith.addf %92, %94 : vector<4x256xf32>
    %96 = arith.addf %95, %30 : vector<4x256xf32>
    %cst_58 = arith.constant 0.000000e+00 : f32
    %97 = vector.broadcast %cst_58 : f32 to vector<4x256xf32>
    %98 = arith.maximumf %96, %97 : vector<4x256xf32>
    %c0_59 = arith.constant 0 : index
    %c0_60 = arith.constant 0 : index
    %c0_61 = arith.constant 0 : index
    %99 = vector.load %arg8[%c0_59, %c0_60, %c0_61] : memref<1x4x256xf32, #tpu.memory_space<vmem>>, vector<1x4x256xf32>
    %100 = vector.shape_cast %99 : vector<1x4x256xf32> to vector<4x256xf32>
    %101 = vector.shape_cast %98 : vector<4x256xf32> to vector<1x4x256xf32>
    tpu.vector_store %arg8[%c0_59, %c0_60, %c0_61], %101 {strides = array<i32>} : memref<1x4x256xf32, #tpu.memory_space<vmem>>, vector<1x4x256xf32>,
    return
  }
  func.func @transform_0(%arg0: i32) -> (i32, i32, i32) {
    %c0_i32 = arith.constant 0 : i32
    %c0_i32_0 = arith.constant 0 : i32
    %c0_i32_1 = arith.constant 0 : i32
    return %arg0, %c0_i32, %c0_i32_0 : i32, i32, i32
  }
  func.func @transform_1(%arg0: i32) -> (i32, i32) {
    %c0_i32 = arith.constant 0 : i32
    %c0_i32_0 = arith.constant 0 : i32
    %c0_i32_1 = arith.constant 0 : i32
    return %c0_i32, %c0_i32_0 : i32, i32
  }
  func.func @transform_2(%arg0: i32) -> (i32, i32) {
    %c0_i32 = arith.constant 0 : i32
    %c0_i32_0 = arith.constant 0 : i32
    %c0_i32_1 = arith.constant 0 : i32
    return %c0_i32, %c0_i32_0 : i32, i32
  }
  func.func @transform_3(%arg0: i32) -> (i32, i32) {
    %c0_i32 = arith.constant 0 : i32
    %c0_i32_0 = arith.constant 0 : i32
    %c0_i32_1 = arith.constant 0 : i32
    return %c0_i32, %c0_i32_0 : i32, i32
  }
  func.func @transform_4(%arg0: i32) -> (i32, i32) {
    %c0_i32 = arith.constant 0 : i32
    %c0_i32_0 = arith.constant 0 : i32
    %c0_i32_1 = arith.constant 0 : i32
    return %c0_i32, %c0_i32_0 : i32, i32
  }
  func.func @transform_5(%arg0: i32) -> (i32, i32) {
    %c0_i32 = arith.constant 0 : i32
    %c0_i32_0 = arith.constant 0 : i32
    %c0_i32_1 = arith.constant 0 : i32
    return %c0_i32, %c0_i32_0 : i32, i32
  }
  func.func @transform_6(%arg0: i32) -> (i32, i32) {
    %c0_i32 = arith.constant 0 : i32
    %c0_i32_0 = arith.constant 0 : i32
    %c0_i32_1 = arith.constant 0 : i32
    return %c0_i32, %c0_i32_0 : i32, i32
  }
  func.func @transform_7(%arg0: i32) -> (i32, i32, i32) {
    %c0_i32 = arith.constant 0 : i32
    %c0_i32_0 = arith.constant 0 : i32
    %c0_i32_1 = arith.constant 0 : i32
    return %arg0, %c0_i32, %c0_i32_0 : i32, i32, i32
  }
}

</mosaic_0001>

<bundles_post_ra>
// kernel: tpu_custom_call.1
= control target key start
LH: loop header
LB: loop body
LE: loop exit
PB: predicated region body
PF: predicated region fallthrough
CT: control target
= control target key end

     0   :  { %12 = vsyncpa [#allocation4], 0  ;;  %s1982_s0 = inlined_call_operand.hbm [shape: f32[2,4,256], index: 0, kind: input, shape index: {}]   ;;  %s1983_s1 = inlined_call_operand.vmem [shape: f32[4,36], index: 1, kind: input, shape index: {}]   ;;  %s1984_s2 = inlined_call_operand.vmem [shape: f32[4,1], index: 2, kind: input, shape index: {}]   ;;  %s1985_s3 = inlined_call_operand.vmem [shape: f32[4,36], index: 3, kind: input, shape index: {}]   ;;  %s1986_s4 = inlined_call_operand.vmem [shape: f32[4,1], index: 4, kind: input, shape index: {}]   ;;  %s1987_s5 = inlined_call_operand.vmem [shape: f32[4,4], index: 5, kind: input, shape index: {}]   ;;  %s1988_s6 = inlined_call_operand.vmem [shape: f32[4,1], index: 6, kind: input, shape index: {}]   ;;  %s1989_s7 = inlined_call_operand.hbm [shape: f32[2,4,256], index: 7, kind: output, shape index: {}]  }
   0x1   :  { %14 = vsyncpa [#allocation4 + $0x1], 0 }
   0x2   :  { %15 = vsyncpa [#allocation5], 0 }
   0x3   :  { %17 = vsyncpa [#allocation5 + $0x1], 0  ;;  %s1560_s24 = smov 0   ;;  %s1562_s25 = smov 0  }
   0x4   :  { %s1564_s26 = smov 0   ;;  %s1566_s27 = smov 0  }
   0x5 LB: > { %s1581_s28 = sadd.s32 4294967295, %s1502_s27   ;;  %s1160_s29 = sadd.s32 4294967294, %s1502_s27   ;;  %s1502_s27 = sphi %s1566_s27, %s2004_s27   ;;  %s1498_s26 = sphi %s1564_s26, %s2003_s26   ;;  %s1494_s25 = sphi %s1562_s25, %s2002_s25   ;;  %s1490_s24 = sphi %s1560_s24, %s2001_s24  }
   0x6   : > { %s1585_s30 = sadd.s32 1, %s1502_s27   ;;  %s30_s8 = sadd.s32 1, %s1498_s26 }
   0x7   : > { %s27_s9 = ssub.s32 %s1502_s27, %s1585_s30  ;;  %p37_p0 = scmp.ne.s32.totalorder %s1498_s26, %s1494_s25 }
   0x8   : > { %p28_p1 = scmp.eq.s32.totalorder %s27_s9, 0  ;;  %p38_p2 = scmp.eq.s32.totalorder %s1502_s27, 0 }
   0x9   : > { %p43_p3 = scmp.ne.s32.totalorder %s1494_s25, %s1490_s24  ;;  %p44_p4 = scmp.eq.s32.totalorder %s1581_s28, 0 }
   0xa   : > { %s1597_s10 = scalar_select %p28_p1, %s1498_s26, %s30_s8  }
   0xb   : > { %p1599_p5 = por %p38_p2, %p37_p0  ;;  %p1603_p6 = por %p44_p4, %p43_p3 }
   0xc   : > { %p193_p7 = scmp.eq.s32.totalorder %s1581_s28, 1  ;;  %p199_p8 = scmp.eq.s32.totalorder %s1160_s29, 1 }
   0xd   : > { %p1217_p10 = scmp.lt.s32.totalorder %s1502_s27, 2  ;;  %s237_s15 = sand.u32 1, %s1498_s26  }
   0xe   : > { %p1610_p11 = por %p193_p7, %p37_p0  ;;  %p1614_p12 = por %p199_p8, %p43_p3 }
   0xf   : > { %s1187_s16 = sshll.u32 %s1502_s27, 7  ;;  %s1163_s17 = sshll.u32 %s237_s15, 3 }
  0x10   : > { %s1993_s13 = scalar_select %p1610_p11, 1, 0 }
  0x11   : > { %s1994_s14 = scalar_select %p1614_p12, 1, 0 }
  0x12   : > { %s1623_s20 = scalar_lea.hbm %s1982_s0, %s1187_s16  ;;  %s241_s21 = scalar_lea.vmem [#allocation3], %s1163_s17 }
  0x13   : > { %s249_s22 = sshll.u32 %s241_s21, 4  ;;  %p1627_p13 = pnand %p1217_p10, %p1599_p5  ;;  %s1631_s22 = int_to_ptr.vmem [resolvable:$true] %s249_s22 }
  0x14   : > { %s238_s29 = scalar_lea.sflag [#allocation4], %s237_s15  ;;  %s1406_s8 = scalar_lea.hbm %s1623_s20, 128 }
  0x15   : > { %p1407_p2 = scmp.ne.s32.totalorder %s1623_s20, %s1406_s8  ;;  %p1408_p3 = pneg %p1627_p13 }
  0x16   : > { %s1411_s16 = scalar_lea.hbm %s1982_s0, 256  ;;  %p1412_p5 = scmp.lt.u32.totalorder %s1623_s20, %s1982_s0 }
  0x17   : > { %p1409_p4 = pnand %p1408_p3, %p1407_p2  ;;  %p1413_p8 = scmp.lt.u32.totalorder %s1411_s16, %s1406_s8 }
  0x18   : > { %p1415_p9 = scmp.lt.u32.totalorder %s1406_s8, %s1623_s20 }
  0x19   : > { %p1410_p7 = pneg %p1409_p4  ;;  %p1414_p10 = por %p1413_p8, %p1412_p5 }
  0x1b   : > { %p1416_p0 = por %p1415_p9, %p1414_p10 }
  0x1d   : > { %p1417_p1 = pnand %p1416_p0, %p1410_p7 }
  0x1f   : > { %1420 = shalt.err (!%p1417_p1)
}
  0x20   : > { %s1421_s15 = scalar_lea.vmem %s1631_s22, 128  ;;  %s1504_s19 = smov [#allocation3]  }
  0x21   : > { %p1422_p2 = scmp.ne.s32.totalorder %s1631_s22, %s1421_s15  ;;  %s1426_s21 = sshll.u32 %s1504_s19, 4  ;;  %s1427_s21 = int_to_ptr.vmem [resolvable:$false] %s1426_s21 }
  0x22   : > { %s1428_s9 = scalar_lea.vmem %s1427_s21, 256  ;;  %p1429_p11 = scmp.lt.s32.totalorder %s1631_s22, %s1427_s21 }
  0x23   : > { %p1424_p4 = pnand %p1422_p2, %p1408_p3  ;;  %p1430_p5 = scmp.lt.s32.totalorder %s1428_s9, %s1421_s15 }
  0x25   : > { %p1425_p12 = pneg %p1424_p4  ;;  %p1431_p8 = por %p1430_p5, %p1429_p11 }
  0x27   : > { %p1432_p9 = pnand %p1431_p8, %p1425_p12 }
  0x29   : > { %1435 = shalt.err (!%p1432_p9)
}
  0x2a   : > { %1212 = dma.hbm_to_vmem [thread:$0]  (!%p1627_p13), %s1623_s20, 128, %s1631_s22, %s238_s29  }
  0x2b   : > { %p1996_p0 = scmp.lt.s32.totalorder %s1502_s27, 3  ;;  %p1997_p1 = scmp.ge.s32.totalorder %s1502_s27, 1 }
  0x2d   : > { %p255_p3 = pnand %p1997_p1, %p1996_p0 }
  0x2e   : > { %s1665_s8 = sand.u32 (!%p255_p3), 1, %s1494_s25   ;;  %v297_v0 = vlaneseq (!%p255_p3) }
  0x2f   : > { %258 = sbr.rel (%p255_p3) target bundleno = 1401 (0x579), region = 48  ;;  %s1167_s11 = sshll.u32 (!%p255_p3), %s1665_s8, 3 }
  0x30   : > { %s261_s16 = scalar_lea.sflag (!%p255_p3), [#allocation4], %s1665_s8  ;;  %s264_s23 = scalar_lea.vmem (!%p255_p3), [#allocation3], %s1167_s11 }
  0x36   : > { %1481 = dma.done.wait (%p1603_p6), %s261_s16, 128  }
  0x37   : > { %1483 = vsyncadd (%p1603_p6), %s261_s16, 4294967168  ;;  %v1505_v1 = vmov 0.0   ;;  %v298_v2 = vand.u32 127, %v297_v0  ;;  %v1680_v7 = vld [vmem:[%s264_s23] sm:$0xff]  ;;  %s1506_s12 = smov 1   ;;  %s1507_s20 = smov 113  }
  0x38   : > { %295 = vst [vmem:[#allocation2] sm:$0xf] %v1505_v1  ;;  %296 = vst [vmem:[#allocation2 + $0xc] sm:$0xf] %v1505_v1  ;;  %673 = vmatprep.mubr.f32.mxu0 %v1505_v1  ;;  %966 = vmatprep.mubr.f32.mxu1 %v1505_v1  ;;  %s1508_s22 = smov 15   ;;  %s1509_s29 = smov 127   ;;  %v496_v19 = vcombine.low %v1680_v7, %v1680_v7  ;;  %v1699_v20 = vcombine.high %v1680_v7, %v1680_v7 }
  0x39   : > { %v299_v3 = vadd.s32 128, %v298_v2  ;;  %v304_v4 = vand.u32 15, %v298_v2  ;;  %337 = vst [vmem:[#allocation2 + $0x4] sm:$0xff] %v1680_v7  ;;  %s1510_s17 = smov 17   ;;  %s1511_s18 = smov 111   ;;  %vm359_vm4 = vcmask 924672  }
  0x3a   : > { %v1275_v21 = vpack.i.bf16 %v1680_v7, %v496_v19  ;;  %s1512_s15 = smov 95   ;;  %vm380_vm5 = vcmask 7168   ;;  %vm368_vm6 = vcmask 1039360   ;;  %vm389_vm7 = vcmask 121856   ;;  %s1513_s19 = smov 96  }
  0x3b   : > { %v311_v5 = vand.u32 15, %v299_v3  ;;  %vm330_vm0 = vcmp.ne.s32.totalorder %v304_v4, 15  ;;  %vm324_vm1 = vcmp.ne.s32.totalorder %v304_v4, 0  ;;  %s1514_s21 = smov 126   ;;  %vm347_vm8 = vcmask 908288   ;;  %s1515_s9 = smov 112  }
  0x3c   : > { %v1171_v6 = vsel %vm330_vm0, 1.0, %v1505_v1  ;;  %v1169_v9 = vsel %vm324_vm1, 1.0, %v1505_v1  ;;  %vm522_vm9 = vcmask 1043456   ;;  %vm398_vm10 = vcmask 138240   ;;  %s1516_s16 = smov 110   ;;  %s1517_s23 = smov 94  }
  0x3d   : > { %vm331_vm2 = vcmp.ne.s32.totalorder %v311_v5, 15  ;;  %vm325_vm3 = vcmp.ne.s32.totalorder %v311_v5, 0  ;;  %vm431_vm11 = vcmask 1031168   ;;  %vm447_vm12 = vcmask 916480   ;;  %p1998_p11 = scmp.ne.s32.totalorder %s1993_s13, 0 }
  0x3e   : > { %v1172_v8 = vsel %vm331_vm2, 1.0, %v1505_v1  ;;  %v1170_v10 = vsel %vm325_vm3, 1.0, %v1505_v1  ;;  %vm473_vm13 = vcmask 900096   ;;  %vm504_vm14 = vcmask 777216  }
  0x3f   : > { %v355_v11 = vcombine.low %v1171_v6, %v1172_v8  ;;  %v343_v12 = vcombine.low %v1169_v9, %v1170_v10  ;;  %v376_v35 = vld [vmem:[#allocation2 + $0xc] sm:$0xf]  ;;  %vm488_vm15 = vcmask 785408   ;;  %vm519_vm0 = vcmask 769024  }
  0x40   : > { %v1686_v13 = vld [vmem:[#allocation2 + $0x8] sm:$0xf]  ;;  %v339_v16 = vld [vmem:[#allocation2] sm:$0xff]  ;;  %v497_v5 = vcombine.low %v376_v35, %v376_v35  ;;  %vm601_vm1 = vcmask 293888   ;;  %vm982_vm2 = vcmask 31744  }
  0x41   : > { %377 = vrot.lane.b32.xlu1 %v355_v11, %s1506_s12  ;;  %356 = vrot.lane.b32.xlu0 %v355_v11, %s1507_s20  ;;  %v1265_v14 = vpack.i.bf16 %v1680_v7, %v343_v12  ;;  %v410_v15 = vcombine.low %v1686_v13, %v1686_v13  ;;  %v409_v18 = vcombine.low %v339_v16, %v339_v16  ;;  %s294_s20 = scalar_lea.vmem [#allocation6], %s1167_s11 }
  0x43   : > { %v1270_v17 = vpack.i.bf16 %v410_v15, %v339_v16 }
  0x45   : > { %386 = vrot.lane.b32.xlu1 %v343_v12, %s1508_s22  ;;  %365 = vrot.lane.b32.xlu0 %v343_v12, %s1509_s29  ;;  %s1090_s22 = sshll.u32 %s294_s20, 4  ;;  %s1940_s22 = int_to_ptr.vmem [resolvable:$true] %s1090_s22 }
  0x49   : > { %395 = vrot.lane.b32.xlu0 %v355_v11, %s1510_s17  ;;  %1266 = vrot.lane.b32.xlu1 %v1265_v14, %s1511_s18 }
  0x4d   : > { %1271 = vrot.lane.b32.xlu0 %v1270_v17, %s1509_s29  ;;  %411 = vrot.lane.b32.xlu1 %v409_v18, %s1509_s29 }
  0x51   : > { %457 = vrot.lane.b32.xlu0 %v1699_v20, %s1511_s18  ;;  %1276 = vrot.lane.b32.xlu1 %v1275_v21, %s1512_s15 }
  0xb3   : > { %v378_v22 = vpop.permute.xlu1 %377  ;;  %v357_v23 = vpop.permute.xlu0 %356 }
  0xb4   : > { %v1706_v24 = vrot.slane %v378_v22, 4  ;;  %v1708_v25 = vrot.slane %v357_v23, 4 }
  0xb6   : > { %v1711_v26 = vsel %vm359_vm4, %v1708_v25, %v357_v23  ;;  %v364_v30 = vmul.f32 %v1708_v25, %v1686_v13  ;;  %v1717_v31 = vsel %vm380_vm5, %v1706_v24, %v378_v22  ;;  %v385_v58 = vmul.f32 %v1706_v24, %v376_v35 }
  0xb7   : > { %v363_v27 = vmul.f32 %v1711_v26, %v339_v16  ;;  %v387_v28 = vpop.permute.xlu1 %386  ;;  %v366_v29 = vpop.permute.xlu0 %365  ;;  %v384_v39 = vmul.f32 %v1717_v31, %v1680_v7 }
  0xb8   : > { %v1719_v32 = vrot.slane %v387_v28, 4  ;;  %v1721_v33 = vrot.slane %v366_v29, 4  ;;  %v466_v0 = vcombine.low %v385_v58, %v385_v58 }
  0xb9   : > { %v424_v34 = vcombine.high %v363_v27, %v363_v27  ;;  %v465_v49 = vcombine.low %v384_v39, %v384_v39 }
  0xba   : > { %v1725_v36 = vsel %vm368_vm6, %v1721_v33, %v366_v29  ;;  %v373_v37 = vmul.f32 %v1721_v33, %v1686_v13  ;;  %v394_v38 = vmul.f32 %v1719_v32, %v376_v35  ;;  %v1736_v44 = vsel %vm389_vm7, %v1719_v32, %v387_v28 }
  0xbb   : > { %v372_v40 = vmul.f32 %v1725_v36, %v339_v16  ;;  %v1285_v41 = vpack.i.bf16 %v364_v30, %v424_v34  ;;  %v396_v42 = vpop.permute.xlu0 %395  ;;  %v1733_v43 = vpop.permute.xlu1 %1266  ;;  %v393_v50 = vmul.f32 %v1736_v44, %v1680_v7  ;;  %v1290_v61 = vpack.i.bf16 %v384_v39, %v465_v49 }
  0xbc   : > { %486 = vrot.lane.b32.xlu0 %v394_v38, %s1513_s19  ;;  %v1268_v45 = vunpack.i.l.bf16 %v1733_v43  ;;  %v440_v47 = vcombine.low %v373_v37, %v373_v37  ;;  %v1751_v55 = vrot.slane %v396_v42, 4  ;;  %v1269_v28 = vunpack.i.h.bf16 %v1733_v43 }
  0xbd   : > { %1286 = vrot.lane.b32.xlu1 %v1285_v41, %s1514_s21  ;;  %v439_v46 = vcombine.low %v372_v40, %v372_v40  ;;  %v481_v60 = vcombine.high %v393_v50, %v393_v50 }
  0xbe   : > { %v1741_v48 = vrot.slane %v1268_v45, 4  ;;  %v1280_v57 = vpack.i.bf16 %v440_v47, %v372_v40  ;;  %v1763_v63 = vsel %vm398_vm10, %v1751_v55, %v396_v42  ;;  %v403_v11 = vmul.f32 %v1751_v55, %v376_v35 }
  0xbf   : > { %v1272_v51 = vpop.permute.xlu0 %1271  ;;  %v412_v52 = vpop.permute.xlu1 %411  ;;  %v1295_v3 = vpack.i.bf16 %v481_v60, %v393_v50  ;;  %v402_v4 = vmul.f32 %v1763_v63, %v1680_v7 }
  0xc0   : > { %425 = vrot.lane.b32.xlu0 %v363_v27, %s1514_s21  ;;  %v1273_v53 = vunpack.i.l.bf16 %v1272_v51  ;;  %v1748_v54 = vsel %vm347_vm8, %v1741_v48, %v1268_v45  ;;  %v1274_v2 = vunpack.i.h.bf16 %v1272_v51  ;;  %v352_v6 = vmul.f32 %v1741_v48, %v1686_v13 }
  0xc1   : > { %441 = vrot.lane.b32.xlu1 %v439_v46, %s1515_s9  ;;  %v351_v56 = vmul.f32 %v1748_v54, %v339_v16  ;;  %v512_v10 = vcombine.high %v402_v4, %v402_v4 }
  0xc2   : > { %v417_v59 = vsel %vm368_vm6, %v412_v52, %v1273_v53  ;;  %v418_v9 = vsel %vm368_vm6, %v1273_v53, %v1274_v2  ;;  %v525_v14 = vsel %vm522_vm9, %v352_v6, %v1274_v2 }
  0xc3   : > { %v1757_v62 = vsel %vm522_vm9, %v351_v56, %v417_v59  ;;  %v405_v8 = vcombine.high %v351_v56, %v351_v56  ;;  %v1277_v13 = vpop.permute.xlu1 %1276  ;;  %v458_v16 = vpop.permute.xlu0 %457 }
  0xc4   : > { %1281 = vrot.lane.b32.xlu0 %v1280_v57, %s1515_s9  ;;  %v1279_v35 = vunpack.i.h.bf16 %v1277_v13  ;;  %v1278_v46 = vunpack.i.l.bf16 %v1277_v13  ;;  %v459_v51 = vsel %vm347_vm8, %v1269_v28, %v458_v16 }
  0xc5   : > { %1291 = vrot.lane.b32.xlu1 %v1290_v61, %s1516_s16  ;;  %v524_v12 = vsel %vm522_vm9, %v405_v8, %v418_v9 }
  0xc6   : > { %v1300_v15 = vpack.i.bf16 %v525_v14, %v524_v12 }
  0xc8   : > { %471 = vrot.lane.b32.xlu0 %v466_v0, %s1516_s16 }
  0xc9   : > { %1296 = vrot.lane.b32.xlu1 %v1295_v3, %s1513_s19 }
  0xcc   : > { %502 = vrot.lane.b32.xlu0 %v497_v5, %s1512_s15 }
  0xcd   : > { %513 = vrot.lane.b32.xlu1 %v402_v4, %s1517_s23  ;;  %v505_v4 = vsel %vm504_vm14, %v1278_v46, %v1279_v35 }
  0xd0   : > { %515 = vrot.lane.b32.xlu0 %v512_v10, %s1517_s23 }
  0xd1   : > { %517 = vrot.lane.b32.xlu1 %v403_v11, %s1517_s23 }
  0xd4   : > { %1301 = vrot.lane.b32.xlu0 %v1300_v15, %s1510_s17 }
 0x12e   : > { %v487_v17 = vpop.permute.xlu0 %486 }
 0x12f   : > { %v1287_v18 = vpop.permute.xlu1 %1286 }
 0x130   : > { %v1289_v22 = vunpack.i.h.bf16 %v1287_v18  ;;  %v1288_v23 = vunpack.i.l.bf16 %v1287_v18  ;;  %v1518_v18 = vmov 0  }
 0x131   : > { %1330 = vset.pattern.permute.xlu1 %v1518_v18  ;;  %1396 = vset.pattern.permute.xlu0 %v1518_v18 }
 0x132   : > { %v426_v19 = vpop.permute.xlu0 %425  ;;  %v433_v39 = vsel %vm431_vm11, %v1288_v23, %v1289_v22 }
 0x133   : > { %v442_v21 = vpop.permute.xlu1 %441  ;;  %v432_v40 = vsel %vm431_vm11, %v426_v19, %v1288_v23 }
 0x136   : > { %v1282_v27 = vpop.permute.xlu0 %1281 }
 0x137   : > { %v1284_v29 = vunpack.i.h.bf16 %v1282_v27  ;;  %v1283_v30 = vunpack.i.l.bf16 %v1282_v27  ;;  %v1292_v34 = vpop.permute.xlu1 %1291 }
 0x138   : > { %v1294_v37 = vunpack.i.h.bf16 %v1292_v34  ;;  %v1293_v38 = vunpack.i.l.bf16 %v1292_v34 }
 0x139   : > { %v448_v41 = vsel %vm447_vm12, %v442_v21, %v1283_v30  ;;  %v449_v42 = vsel %vm447_vm12, %v1283_v30, %v1284_v29  ;;  %v528_v45 = vsel %vm522_vm9, %v1289_v22, %v1284_v29  ;;  %v535_v22 = vld [vmem:[%s1984_s2] sm:$0xf] }
 0x13a   : > { %v472_v47 = vpop.permute.xlu0 %471  ;;  %v527_v43 = vsel %vm522_vm9, %v433_v39, %v449_v42  ;;  %v526_v49 = vsel %vm522_vm9, %v432_v40, %v448_v41  ;;  %v474_v50 = vsel %vm473_vm13, %v1293_v38, %v1294_v37  ;;  %v529_v12 = vsel %vm522_vm9, %v1269_v28, %v1293_v38 }
 0x13b   : > { %v475_v52 = vsel %vm473_vm13, %v1294_v37, %v472_v47  ;;  %v1297_v53 = vpop.permute.xlu1 %1296  ;;  %v1305_v56 = vpack.i.bf16 %v528_v45, %v527_v43  ;;  %v1310_v57 = vpack.i.bf16 %v526_v49, %v1757_v62  ;;  %v530_v61 = vsel %vm522_vm9, %v459_v51, %v474_v50 }
 0x13c   : > { %v531_v58 = vsel %vm522_vm9, %v458_v16, %v475_v52  ;;  %v1299_v59 = vunpack.i.h.bf16 %v1297_v53  ;;  %v1298_v60 = vunpack.i.l.bf16 %v1297_v53 }
 0x13d   : > { %1306 = vrot.lane.b32.xlu1 %v1305_v56, %s1510_s17  ;;  %1311 = vrot.lane.b32.xlu0 %v1310_v57, %s1510_s17  ;;  %v1315_v6 = vpack.i.bf16 %v531_v58, %v530_v61 }
 0x13e   : > { %v489_v0 = vsel %vm488_vm15, %v1298_v60, %v1299_v59  ;;  %v503_v2 = vpop.permute.xlu0 %502  ;;  %v490_v3 = vsel %vm488_vm15, %v1299_v59, %v487_v17  ;;  %v532_v10 = vsel %vm522_vm9, %v1298_v60, %v1278_v46  ;;  %v1808_v17 = vld [vmem:[#allocation2 + $0xc] sm:$0xf] }
 0x13f   : > { %v506_v5 = vsel %vm504_vm14, %v1279_v35, %v503_v2  ;;  %v514_v62 = vpop.permute.xlu1 %513  ;;  %v533_v8 = vsel %vm522_vm9, %v489_v0, %v505_v4  ;;  %v1320_v15 = vpack.i.bf16 %v532_v10, %v529_v12  ;;  %v700_v21 = vmul.f32 %v1808_v17, %v1706_v24 }
 0x140   : > { %v534_v9 = vsel %vm522_vm9, %v490_v3, %v506_v5  ;;  %v702_v27 = vmul.f32 %v1808_v17, %v1719_v32 }
 0x141   : > { %1316 = vrot.lane.b32.xlu1 %v1315_v6, %s1510_s17  ;;  %v1325_v11 = vpack.i.bf16 %v534_v9, %v533_v8  ;;  %v765_v23 = vcombine.low %v700_v21, %v700_v21  ;;  %v338_v6 = vld [vmem:[%s1983_s1] sm:$0xf] }
 0x142   : > { %v516_v14 = vpop.permute.xlu0 %515 }
 0x143   : > { %1326 = vrot.lane.b32.xlu0 %v1325_v11, %s1510_s17  ;;  %v518_v13 = vpop.permute.xlu1 %517  ;;  %v520_v16 = vsel %vm519_vm0, %v514_v62, %v516_v14 }
 0x144   : > { %v521_v19 = vsel %vm519_vm0, %v516_v14, %v518_v13 }
 0x145   : > { %1321 = vrot.lane.b32.xlu1 %v1320_v15, %s1510_s17 }
 0x146   : > { %v1302_v28 = vpop.permute.xlu0 %1301 }
 0x147   : > { %579 = vrot.lane.b32.xlu0 %v520_v16, %s1510_s17  ;;  %v1304_v29 = vunpack.i.h.bf16 %v1302_v28  ;;  %v1303_v30 = vunpack.i.l.bf16 %v1302_v28 }
 0x149   : > { %581 = vrot.lane.b32.xlu1 %v521_v19, %s1510_s17  ;;  %v584_v40 = vsel %vm398_vm10, %v1303_v30, %v1304_v29 }
 0x14b   : > { %577 = vrot.lane.b32.xlu0 %v514_v62, %s1510_s17 }
 0x14d   : > { %538 = vperm.xlu1 %1330, %v535_v22  }
 0x14f   : > { %770 = vrot.lane.b32.xlu0 %v765_v23, %s1516_s16 }
 0x153   : > { %784 = vrot.lane.b32.xlu0 %v702_v27, %s1513_s19 }
 0x1af   : > { %v1307_v34 = vpop.permute.xlu1 %1306  ;;  %v1312_v24 = vpop.permute.xlu0 %1311 }
 0x1b0   : > { %v1309_v35 = vunpack.i.h.bf16 %v1307_v34  ;;  %v1308_v37 = vunpack.i.l.bf16 %v1307_v34  ;;  %v1314_v38 = vunpack.i.h.bf16 %v1312_v24  ;;  %v1313_v39 = vunpack.i.l.bf16 %v1312_v24 }
 0x1b2   : > { %v586_v41 = vsel %vm398_vm10, %v1308_v37, %v1309_v35  ;;  %v583_v42 = vsel %vm398_vm10, %v1313_v39, %v1303_v30  ;;  %v585_v45 = vsel %vm398_vm10, %v1314_v38, %v1308_v37 }
 0x1b3   : > { %v1317_v32 = vpop.permute.xlu1 %1316  ;;  %v1189_v46 = vpack.c.bf16 %v586_v41, %v584_v40  ;;  %v1191_v47 = vpack.c.bf16 %v585_v45, %v583_v42 }
 0x1b4   : > { %v1319_v43 = vunpack.i.h.bf16 %v1317_v32  ;;  %v1318_v49 = vunpack.i.l.bf16 %v1317_v32 }
 0x1b5   : > { %v1327_v50 = vpop.permute.xlu0 %1326  ;;  %1190 = vmatprep.subr.bf16.mxu0 %v1189_v46  ;;  %v704_v46 = vmul.f32 %v1808_v17, %v1751_v55 }
 0x1b6   : > { %v1329_v51 = vunpack.i.h.bf16 %v1327_v50  ;;  %v1328_v52 = vunpack.i.l.bf16 %v1327_v50  ;;  %1192 = vmatpush1.bf16.msra.mxu0 %v1191_v47  ;;  %v588_v58 = vsel %vm398_vm10, %v1318_v49, %v1319_v43 }
 0x1b7   : > { %v1322_v53 = vpop.permute.xlu1 %1321 }
 0x1b8   : > { %v1324_v56 = vunpack.i.h.bf16 %v1322_v53  ;;  %v1323_v57 = vunpack.i.l.bf16 %v1322_v53  ;;  %v590_v59 = vsel %vm398_vm10, %v1328_v52, %v1329_v51 }
 0x1b9   : > { %v580_v60 = vpop.permute.xlu0 %579  ;;  %v1193_v61 = vpack.c.bf16 %v590_v59, %v588_v58 }
 0x1ba   : > { %v587_v0 = vsel %vm398_vm10, %v1323_v57, %v1318_v49  ;;  %v589_v2 = vsel %vm398_vm10, %v1324_v56, %v1328_v52 }
 0x1bb   : > { %v582_v3 = vpop.permute.xlu1 %581  ;;  %1194 = vmatprep.subr.bf16.mxu0 %v1193_v61  ;;  %v1195_v4 = vpack.c.bf16 %v589_v2, %v587_v0 }
 0x1bc   : > { %v592_v5 = vsel %vm398_vm10, %v580_v60, %v582_v3 }
 0x1bd   : > { %v578_v62 = vpop.permute.xlu0 %577  ;;  %1196 = vmatpush1.bf16.msra.mxu0 %v1195_v4 }
 0x1be   : > { %1173 = vmatprep.subr.msk.mxu0 %vm522_vm9, %v592_v5  ;;  %v591_v8 = vsel %vm398_vm10, %v578_v62, %v580_v60 }
 0x1c1   : > { %1174 = vmatpush1.msk.msra.mxu0 %vm522_vm9, %v591_v8  ;;  %v771_v47 = vpop.permute.xlu0 %770 }
 0x1c2   : > { %1175 = vmatmul.mubr.msk.f32.vlgmr.msra.gmra.mrb[0].mxu0 %vm601_vm1, %v338_v6 }
 0x1c3   : > { %1056 = vmatprep.mubr.f32.mxu0 %v1505_v1 }
 0x1c5   : > { %v785_v43 = vpop.permute.xlu0 %784 }
 0x1cc   : > { %v539_v9 = vpop.permute.xlu1 %538 }
 0x295   : > { %v675_v10 = vpop.f32.mrb[0].mxu0 }
 0x296   : > { %v676_v11 = vadd.f32 %v675_v10, %v539_v9  ;;  %v677_v12 = vpop.f32.mrb[1].mxu0 }
 0x297   : > { %v678_v14 = vadd.f32 %v677_v12, %v539_v9 }
 0x298   : > { %v680_v15 = vmax.f32 %v676_v11, 0.0 }
 0x299   : > { %v681_v13 = vmax.f32 %v678_v14, 0.0 }
 0x29a   : > { %v1404_v23 = vcombine.low %v680_v15, %v680_v15 }
 0x29b   : > { %v684_v16 = vcombine.low %v680_v15, %v681_v13  ;;  %v1405_v34 = vcombine.low %v681_v13, %v681_v13 }
 0x29d   : > { %686 = vst [vmem:[#allocation2 + $0x4] sm:$0xff] %v684_v16  ;;  %v1341_v1 = vpack.i.bf16 %v684_v16, %v1404_v23  ;;  %v1336_v38 = vpack.i.bf16 %v1405_v34, %v684_v16  ;;  %v703_v45 = vmul.f32 %v684_v16, %v1763_v63 }
 0x2a4   : > { %v688_v18 = vld [vmem:[#allocation2] sm:$0xff]  ;;  %v689_v19 = vld [vmem:[#allocation2 + $0x8] sm:$0xf] }
 0x2a5   : > { %v710_v21 = vcombine.low %v688_v18, %v688_v18  ;;  %v711_v22 = vcombine.low %v689_v19, %v689_v19  ;;  %v692_v27 = vmul.f32 %v688_v18, %v1711_v26  ;;  %v693_v30 = vmul.f32 %v689_v19, %v1708_v25 }
 0x2a6   : > { %v695_v24 = vmul.f32 %v689_v19, %v1721_v33  ;;  %v694_v37 = vmul.f32 %v688_v18, %v1725_v36  ;;  %v699_v26 = vmul.f32 %v684_v16, %v1717_v31  ;;  %v701_v25 = vmul.f32 %v684_v16, %v1736_v44 }
 0x2a7   : > { %712 = vrot.lane.b32.xlu1 %v710_v21, %s1509_s29  ;;  %v1331_v28 = vpack.i.bf16 %v711_v22, %v688_v18  ;;  %v725_v29 = vcombine.high %v692_v27, %v692_v27  ;;  %v794_v36 = vcombine.low %v1808_v17, %v1808_v17  ;;  %v808_v44 = vcombine.high %v703_v45, %v703_v45 }
 0x2a8   : > { %v740_v39 = vcombine.low %v695_v24, %v695_v24  ;;  %v739_v40 = vcombine.low %v694_v37, %v694_v37  ;;  %v764_v41 = vcombine.low %v699_v26, %v699_v26  ;;  %v779_v31 = vcombine.high %v701_v25, %v701_v25 }
 0x2a9   : > { %1332 = vrot.lane.b32.xlu0 %v1331_v28, %s1509_s29  ;;  %v1346_v35 = vpack.i.bf16 %v693_v30, %v725_v29  ;;  %v690_v63 = vmul.f32 %v688_v18, %v1748_v54  ;;  %v691_v56 = vmul.f32 %v689_v19, %v1741_v48 }
 0x2aa   : > { %v1351_v33 = vpack.i.bf16 %v740_v39, %v694_v37  ;;  %v1356_v42 = vpack.i.bf16 %v699_v26, %v764_v41  ;;  %v1361_v32 = vpack.i.bf16 %v779_v31, %v701_v25 }
 0x2ab   : > { %1342 = vrot.lane.b32.xlu1 %v1341_v1, %s1512_s15  ;;  %v706_v57 = vcombine.high %v690_v63, %v690_v63 }
 0x2ad   : > { %726 = vrot.lane.b32.xlu0 %v692_v27, %s1514_s21 }
 0x2af   : > { %1347 = vrot.lane.b32.xlu1 %v1346_v35, %s1514_s21 }
 0x2b1   : > { %1337 = vrot.lane.b32.xlu0 %v1336_v38, %s1511_s18 }
 0x2b3   : > { %741 = vrot.lane.b32.xlu1 %v739_v40, %s1515_s9 }
 0x2b5   : > { %1352 = vrot.lane.b32.xlu0 %v1351_v33, %s1515_s9 }
 0x2b7   : > { %1357 = vrot.lane.b32.xlu1 %v1356_v42, %s1516_s16 }
 0x2b9   : > { %799 = vrot.lane.b32.xlu0 %v794_v36, %s1512_s15  ;;  %s1436_s15 = scalar_lea.vmem %s1940_s22, 128 }
 0x2ba   : > { %p1437_p6 = scmp.ne.s32.totalorder %s1940_s22, %s1436_s15 }
 0x2bb   : > { %1362 = vrot.lane.b32.xlu1 %v1361_v32, %s1513_s19 }
 0x2bc   : > { %p1438_p12 = pnand %p1437_p6, %p1998_p11 }
 0x2bd   : > { %811 = vrot.lane.b32.xlu0 %v808_v44, %s1517_s23 }
 0x2be   : > { %p1439_p13 = pneg %p1438_p12 }
 0x2bf   : > { %809 = vrot.lane.b32.xlu1 %v703_v45, %s1517_s23 }
 0x2c3   : > { %813 = vrot.lane.b32.xlu1 %v704_v46, %s1517_s23  ;;  %s1188_s23 = sshll.u32 %s1581_s28, 7  ;;  %s1519_s28 = smov [#allocation6]  }
 0x2c4   : > { %s1938_s18 = scalar_lea.hbm %s1989_s7, %s1188_s23  ;;  %s1440_s11 = sshll.u32 %s1519_s28, 4  ;;  %s1441_s11 = int_to_ptr.vmem [resolvable:$false] %s1440_s11 }
 0x2c5   : > { %s1442_s19 = scalar_lea.vmem %s1441_s11, 256  ;;  %p1443_p7 = scmp.lt.s32.totalorder %s1940_s22, %s1441_s11 }
 0x2c6   : > { %p1444_p10 = scmp.lt.s32.totalorder %s1442_s19, %s1436_s15 }
 0x2c8   : > { %p1445_p2 = por %p1444_p10, %p1443_p7 }
 0x2ca   : > { %p1446_p4 = pnand %p1445_p2, %p1439_p13 }
 0x319   : > { %v713_v49 = vpop.permute.xlu1 %712 }
 0x31b   : > { %v1333_v50 = vpop.permute.xlu0 %1332 }
 0x31c   : > { %v1335_v51 = vunpack.i.h.bf16 %v1333_v50  ;;  %v1334_v52 = vunpack.i.l.bf16 %v1333_v50  ;;  %v829_v50 = vld [vmem:[%s1986_s4] sm:$0xf] }
 0x31d   : > { %v1343_v53 = vpop.permute.xlu1 %1342 }
 0x31e   : > { %v719_v58 = vsel %vm368_vm6, %v1334_v52, %v1335_v51  ;;  %v819_v55 = vsel %vm522_vm9, %v691_v56, %v1335_v51  ;;  %v718_v4 = vsel %vm368_vm6, %v713_v49, %v1334_v52  ;;  %v1345_v9 = vunpack.i.h.bf16 %v1343_v53 }
 0x31f   : > { %v727_v59 = vpop.permute.xlu0 %726  ;;  %v818_v60 = vsel %vm522_vm9, %v706_v57, %v719_v58  ;;  %v1344_v10 = vunpack.i.l.bf16 %v1343_v53  ;;  %v817_v22 = vsel %vm522_vm9, %v690_v63, %v718_v4 }
 0x320   : > { %v1366_v17 = vpack.i.bf16 %v819_v55, %v818_v60 }
 0x321   : > { %v1348_v61 = vpop.permute.xlu1 %1347  ;;  %v801_v39 = vsel %vm504_vm14, %v1344_v10, %v1345_v9 }
 0x322   : > { %1367 = vrot.lane.b32.xlu0 %v1366_v17, %s1510_s17  ;;  %v1350_v54 = vunpack.i.h.bf16 %v1348_v61  ;;  %v1349_v2 = vunpack.i.l.bf16 %v1348_v61 }
 0x323   : > { %v1338_v0 = vpop.permute.xlu0 %1337 }
 0x324   : > { %v1340_v48 = vunpack.i.h.bf16 %v1338_v0  ;;  %v1339_v62 = vunpack.i.l.bf16 %v1338_v0  ;;  %v732_v11 = vsel %vm431_vm11, %v727_v59, %v1349_v2  ;;  %v733_v12 = vsel %vm431_vm11, %v1349_v2, %v1350_v54 }
 0x325   : > { %v742_v3 = vpop.permute.xlu1 %741 }
 0x326   : > { %v758_v27 = vsel %vm347_vm8, %v1339_v62, %v1340_v48 }
 0x327   : > { %v1353_v5 = vpop.permute.xlu0 %1352 }
 0x328   : > { %v1355_v6 = vunpack.i.h.bf16 %v1353_v5  ;;  %v1354_v8 = vunpack.i.l.bf16 %v1353_v5 }
 0x329   : > { %v1358_v14 = vpop.permute.xlu1 %1357 }
 0x32a   : > { %v747_v15 = vsel %vm447_vm12, %v742_v3, %v1354_v8  ;;  %v748_v13 = vsel %vm447_vm12, %v1354_v8, %v1355_v6  ;;  %v1360_v16 = vunpack.i.h.bf16 %v1358_v14  ;;  %v1359_v18 = vunpack.i.l.bf16 %v1358_v14 }
 0x32b   : > { %v821_v19 = vsel %vm522_vm9, %v733_v12, %v748_v13  ;;  %v822_v21 = vsel %vm522_vm9, %v1350_v54, %v1355_v6  ;;  %v820_v23 = vsel %vm522_vm9, %v732_v11, %v747_v15  ;;  %v800_v30 = vpop.permute.xlu0 %799 }
 0x32c   : > { %v773_v28 = vsel %vm473_vm13, %v1360_v16, %v771_v47  ;;  %v772_v1 = vsel %vm473_vm13, %v1359_v18, %v1360_v16  ;;  %v1371_v29 = vpack.i.bf16 %v822_v21, %v821_v19  ;;  %v1376_v24 = vpack.i.bf16 %v820_v23, %v817_v22 }
 0x32d   : > { %v1363_v34 = vpop.permute.xlu1 %1362  ;;  %v824_v35 = vsel %vm522_vm9, %v758_v27, %v772_v1  ;;  %v825_v37 = vsel %vm522_vm9, %v1340_v48, %v773_v28  ;;  %v802_v40 = vsel %vm504_vm14, %v1345_v9, %v800_v30  ;;  %v823_v44 = vsel %vm522_vm9, %v1339_v62, %v1359_v18  ;;  %v687_v27 = vld [vmem:[%s1985_s3] sm:$0xf] }
 0x32e   : > { %v1365_v26 = vunpack.i.h.bf16 %v1363_v34  ;;  %v1364_v38 = vunpack.i.l.bf16 %v1363_v34  ;;  %1372 = vrot.lane.b32.xlu1 %v1371_v29, %s1510_s17  ;;  %1377 = vrot.lane.b32.xlu0 %v1376_v24, %s1510_s17  ;;  %v1381_v33 = vpack.i.bf16 %v825_v37, %v824_v35  ;;  %v976_v1 = vld [vmem:[%s1988_s6] sm:$0xf] }
 0x32f   : > { %v812_v47 = vpop.permute.xlu0 %811 }
 0x330   : > { %v787_v41 = vsel %vm488_vm15, %v1365_v26, %v785_v43  ;;  %v786_v25 = vsel %vm488_vm15, %v1364_v38, %v1365_v26  ;;  %v826_v45 = vsel %vm522_vm9, %v1364_v38, %v1344_v10  ;;  %v975_v38 = vld [vmem:[%s1987_s5] sm:$0xf] }
 0x331   : > { %v810_v42 = vpop.permute.xlu1 %809  ;;  %v827_v36 = vsel %vm522_vm9, %v786_v25, %v801_v39  ;;  %v828_v31 = vsel %vm522_vm9, %v787_v41, %v802_v40  ;;  %v1386_v46 = vpack.i.bf16 %v826_v45, %v823_v44 }
 0x332   : > { %1382 = vrot.lane.b32.xlu1 %v1381_v33, %s1510_s17  ;;  %v1391_v32 = vpack.i.bf16 %v828_v31, %v827_v36  ;;  %v815_v49 = vsel %vm519_vm0, %v810_v42, %v812_v47 }
 0x334   : > { %1392 = vrot.lane.b32.xlu0 %v1391_v32, %s1510_s17 }
 0x335   : > { %v814_v43 = vpop.permute.xlu1 %813 }
 0x336   : > { %1387 = vrot.lane.b32.xlu1 %v1386_v46, %s1510_s17  ;;  %v816_v63 = vsel %vm519_vm0, %v812_v47, %v814_v43 }
 0x338   : > { %873 = vrot.lane.b32.xlu0 %v815_v49, %s1510_s17 }
 0x33a   : > { %875 = vrot.lane.b32.xlu1 %v816_v63, %s1510_s17 }
 0x33c   : > { %871 = vrot.lane.b32.xlu0 %v810_v42, %s1510_s17  ;;  %s1076_s17 = scalar_lea.sflag [#allocation5], %s1665_s8 }
 0x33e   : > { %832 = vperm.xlu1 %1330, %v829_v50  }
 0x340   : > { %979 = vperm.xlu0 %1396, %v976_v1  }
 0x394   : > { %v1368_v51 = vpop.permute.xlu0 %1367 }
 0x395   : > { %v1370_v52 = vunpack.i.h.bf16 %v1368_v51  ;;  %v1369_v53 = vunpack.i.l.bf16 %v1368_v51 }
 0x397   : > { %v878_v17 = vsel %vm398_vm10, %v1369_v53, %v1370_v52 }
 0x3a0   : > { %v1373_v56 = vpop.permute.xlu1 %1372  ;;  %v1378_v59 = vpop.permute.xlu0 %1377 }
 0x3a1   : > { %v1375_v57 = vunpack.i.h.bf16 %v1373_v56  ;;  %v1374_v58 = vunpack.i.l.bf16 %v1373_v56  ;;  %v1380_v60 = vunpack.i.h.bf16 %v1378_v59  ;;  %v1379_v55 = vunpack.i.l.bf16 %v1378_v59 }
 0x3a3   : > { %v880_v61 = vsel %vm398_vm10, %v1374_v58, %v1375_v57  ;;  %v877_v2 = vsel %vm398_vm10, %v1379_v55, %v1369_v53  ;;  %v879_v3 = vsel %vm398_vm10, %v1380_v60, %v1374_v58 }
 0x3a4   : > { %v1383_v0 = vpop.permute.xlu1 %1382  ;;  %v1197_v54 = vpack.c.bf16 %v880_v61, %v878_v17  ;;  %v1199_v48 = vpack.c.bf16 %v879_v3, %v877_v2 }
 0x3a5   : > { %v1385_v4 = vunpack.i.h.bf16 %v1383_v0  ;;  %v1384_v5 = vunpack.i.l.bf16 %v1383_v0 }
 0x3a6   : > { %v1393_v62 = vpop.permute.xlu0 %1392  ;;  %1198 = vmatprep.subr.bf16.mxu1 %v1197_v54 }
 0x3a7   : > { %v1395_v6 = vunpack.i.h.bf16 %v1393_v62  ;;  %v1394_v8 = vunpack.i.l.bf16 %v1393_v62  ;;  %1200 = vmatpush1.bf16.msra.mxu1 %v1199_v48  ;;  %v882_v12 = vsel %vm398_vm10, %v1384_v5, %v1385_v4 }
 0x3a8   : > { %v1388_v9 = vpop.permute.xlu1 %1387 }
 0x3a9   : > { %v1390_v10 = vunpack.i.h.bf16 %v1388_v9  ;;  %v1389_v11 = vunpack.i.l.bf16 %v1388_v9  ;;  %v884_v14 = vsel %vm398_vm10, %v1394_v8, %v1395_v6 }
 0x3aa   : > { %v874_v15 = vpop.permute.xlu0 %873  ;;  %v1201_v13 = vpack.c.bf16 %v884_v14, %v882_v12 }
 0x3ab   : > { %v881_v16 = vsel %vm398_vm10, %v1389_v11, %v1384_v5  ;;  %v883_v18 = vsel %vm398_vm10, %v1390_v10, %v1394_v8 }
 0x3ac   : > { %v876_v19 = vpop.permute.xlu1 %875  ;;  %1202 = vmatprep.subr.bf16.mxu1 %v1201_v13  ;;  %v1203_v21 = vpack.c.bf16 %v883_v18, %v881_v16 }
 0x3ad   : > { %v886_v22 = vsel %vm398_vm10, %v874_v15, %v876_v19 }
 0x3ae   : > { %v872_v23 = vpop.permute.xlu0 %871  ;;  %1204 = vmatpush1.bf16.msra.mxu1 %v1203_v21 }
 0x3af   : > { %1176 = vmatprep.subr.msk.mxu1 %vm522_vm9, %v886_v22  ;;  %v885_v28 = vsel %vm398_vm10, %v872_v23, %v874_v15 }
 0x3b2   : > { %1177 = vmatpush1.msk.msra.mxu1 %vm522_vm9, %v885_v28 }
 0x3b3   : > { %1178 = vmatmul.mubr.msk.f32.vlgmr.msra.gmra.mrb[0].mxu1 %vm601_vm1, %v687_v27 }
 0x3bd   : > { %v833_v29 = vpop.permute.xlu1 %832 }
 0x3bf   : > { %v980_v39 = vpop.permute.xlu0 %979 }
 0x486   : > { %v968_v30 = vpop.f32.mrb[0].mxu1 }
 0x487   : > { %v969_v34 = vadd.f32 %v968_v30, %v833_v29  ;;  %v970_v24 = vpop.f32.mrb[1].mxu1 }
 0x488   : > { %v971_v35 = vadd.f32 %v970_v24, %v833_v29 }
 0x489   : > { %v973_v26 = vmax.f32 %v969_v34, 0.0 }
 0x48a   : > { %v974_v37 = vmax.f32 %v971_v35, 0.0 }
 0x48c   : > { %1179 = vmatprep.subr.msk.mxu0 %vm522_vm9, %v974_v37 }
 0x48d   : > { %1180 = vmatpush1.msk.msra.mxu0 %vm522_vm9, %v973_v26 }
 0x48e   : > { %1181 = vmatmul.mubr.msk.f32.vlgmr.msra.gmra.mrb[2].mxu0 %vm982_vm2, %v975_v38 }
 0x561   : > { %v1058_v40 = vpop.f32.mrb[2].mxu0 }
 0x562   : > { %v1059_v41 = vadd.f32 %v1058_v40, %v980_v39  ;;  %v1060_v25 = vpop.f32.mrb[3].mxu0 }
 0x563   : > { %v1061_v33 = vadd.f32 %v1060_v25, %v980_v39 }
 0x564   : > { %v1066_v42 = vadd.f32 %v1059_v41, %v1680_v7 }
 0x565   : > { %v1067_v36 = vadd.f32 %v1061_v33, %v1699_v20 }
 0x566   : > { %v1068_v31 = vmax.f32 %v1066_v42, 0.0 }
 0x567   : > { %v1069_v45 = vmax.f32 %v1067_v36, 0.0 }
 0x569   : > { %v1072_v32 = vcombine.low %v1068_v31, %v1069_v45 }
 0x56b   : > { %1074 = vst [vmem:[%s294_s20] sm:$0xff] %v1072_v32 }
 0x56c   : > { %1449 = shalt.err (!%p1446_p4)
}
 0x56d   : > { %s1450_s8 = scalar_lea.hbm %s1938_s18, 128  ;;  %s1454_s16 = scalar_lea.hbm %s1989_s7, 256 }
 0x56e   : > { %p1451_p5 = scmp.ne.s32.totalorder %s1938_s18, %s1450_s8  ;;  %p1455_p0 = scmp.lt.u32.totalorder %s1938_s18, %s1989_s7 }
 0x56f   : > { %p1456_p1 = scmp.lt.u32.totalorder %s1454_s16, %s1450_s8  ;;  %p1458_p6 = scmp.lt.u32.totalorder %s1450_s8, %s1938_s18 }
 0x570   : > { %p1452_p8 = pnand %p1451_p5, %p1998_p11 }
 0x571   : > { %p1457_p3 = por %p1456_p1, %p1455_p0 }
 0x572   : > { %p1453_p9 = pneg %p1452_p8 }
 0x573   : > { %p1459_p12 = por %p1458_p6, %p1457_p3 }
 0x575   : > { %p1460_p13 = pnand %p1459_p12, %p1453_p9 }
 0x577   : > { %1463 = shalt.err (!%p1460_p13)
}
 0x578   : > { %1207 = dma.vmem_to_hbm [thread:$0]  (%p1998_p11), %s1940_s22, 128, %s1938_s18, %s1076_s17  }
 0x579 PF: > { %s1102_s12 = sand.u32 1, %s1490_s24   ;;  %p1999_p7 = scmp.ne.s32.totalorder %s1994_s14, 0 }
 0x57a   : > { %p2000_p10 = scmp.ge.s32.totalorder %s1502_s27, 2  ;;  %s1103_s29 = scalar_lea.sflag [#allocation5], %s1102_s12 }
 0x57c   : > { %p1214_p2 = pnand %p2000_p10, %p1999_p7 }
 0x57e   : > { %1485 = dma.done.wait (!%p1214_p2), %s1103_s29, 128  }
 0x57f   : > { %1487 = vsyncadd (!%p1214_p2), %s1103_s29, 4294967168  ;;  %p20_p4 = scmp.ge.s32.totalorder %s1585_s30, 4   ;;  %s2001_s24 = smov %s1494_s25 }
 0x580   : > { %s2002_s25 = smov %s1498_s26  ;;  %s2003_s26 = smov %s1597_s10 }
 0x581   : > { %s2004_s27 = smov %s1585_s30  ;;  %22 = sbr.rel (!%p20_p4) target bundleno = 5 (0x5), region = 93 }
 0x588   :  { %1108 = vsyncpa [#allocation4], 1 }
 0x589   :  { %1110 = vsyncpa [#allocation4 + $0x1], 1 }
 0x58a   :  { %1111 = vsyncpa [#allocation5], 1 }
 0x58b   :  { %1113 = vsyncpa [#allocation5 + $0x1], 1 }

</bundles_post_ra>
